<compile_context>
chip_gen: v5e
topology: v5e:2x2
jax: 0.10.0
libtpu: 0.0.40
codegen_flags: <defaults>
</compile_context>

<pallas_src>
import jax
import jax.numpy as jnp
from jax import lax
from jax.experimental import pallas as pl
from jax.experimental.pallas import tpu as pltpu


def _round_up(n, m):
    return ((n + m - 1) // m) * m


def _largest_tile(dim, candidates=(512, 256, 128)):
    for c in candidates:
        if dim % c == 0:
            return min(c, dim)
    return dim


def _vmem_budget_bytes():
    # Leave headroom for Mosaic internal scratch: ~40 MiB on v7x (64 MiB/TC),
    # ~80 MiB on v5e/v6e (128 MiB).  Conservative default if the query fails.
    try:
        cap = int(getattr(pltpu.get_tpu_info(), "vmem_capacity_bytes", 64 << 20))
    except Exception:
        cap = 64 << 20
    return int(min(max(cap * 5 // 8, 32 << 20), 80 << 20))


def _make_resident_kernel(h_slab):
    """Resident-W1 path: one grid axis over batch tiles."""

    def kernel(x_ref, w1_ref, bw_ref, b2_ref, out_ref):
        tb = x_ref.shape[0]
        h_pad = w1_ref.shape[0]
        n_slabs = h_pad // h_slab
        xv = x_ref[...]                                   # (TB, D), loop-invariant

        def slab(h, z):
            start = pl.multiple_of(h * h_slab, h_slab)
            w1s = w1_ref[pl.ds(start, h_slab), :]         # (h_slab, D)
            bws = bw_ref[pl.ds(start, h_slab), :]         # (h_slab, 2) f32
            # hT = W1_slab @ x^T : batch on lanes, f32 accumulation on the MXU.
            hT = lax.dot_general(w1s, xv, (((1,), (1,)), ((), ())),
                                 preferred_element_type=jnp.float32)
            hT = jnp.maximum(hT + bws[:, 0:1], 0.0)       # bias + ReLU
            # fc2 (width 1): VPU multiply + XLU sublane reduce - no MXU pass.
            return z + jnp.sum(hT * bws[:, 1:2], axis=0, keepdims=True)

        z = lax.fori_loop(0, n_slabs, slab, jnp.zeros((1, tb), jnp.float32),
                          unroll=(n_slabs <= 8))
        out_ref[...] = jax.nn.sigmoid(z + b2_ref[0]).astype(out_ref.dtype)

    return kernel


def _ktiled_kernel(x_ref, w1_ref, bw_ref, b2_ref, out_ref, acc_ref):
    """D_in-tiled fallback: grid (batch tiles, K tiles), f32 accumulator."""
    k = pl.program_id(1)

    @pl.when(k == 0)
    def _init():
        acc_ref[...] = jnp.zeros_like(acc_ref)

    acc_ref[...] += lax.dot_general(w1_ref[...], x_ref[...],
                                    (((1,), (1,)), ((), ())),
                                    preferred_element_type=jnp.float32)

    @pl.when(k == pl.num_programs(1) - 1)
    def _finalize():
        bw = bw_ref[...]
        hT = jnp.maximum(acc_ref[...] + bw[:, 0:1], 0.0)
        z = jnp.sum(hT * bw[:, 1:2], axis=0, keepdims=True) + b2_ref[0]
        out_ref[...] = jax.nn.sigmoid(z).astype(out_ref.dtype)


def classifier_forward(x, w1, b1, w2, b2, *, block_b=None,
                       matmul_dtype=jnp.bfloat16, force_k_tiled=False):
    """Forward pass of Classifier (fc1 -> ReLU -> fc2 -> sigmoid).

    x:  (B, D_in) float32
    w1: (H, D_in)  == torch fc1.weight
    b1: (H,)       == torch fc1.bias
    w2: (1, H)     == torch fc2.weight
    b2: (1,)       == torch fc2.bias
    matmul_dtype: dtype of the fc1 MXU operands (bf16 default, f32 accumulation
                  is always kept).  Pass jnp.float32 for exact-f32 fc1.
    returns (B, 1) float32
    """
    B, D_in = x.shape
    H = w1.shape[0]
    cd = jnp.dtype(matmul_dtype) if matmul_dtype is not None else jnp.dtype(jnp.float32)
    esz = cd.itemsize

    # Pad contraction / hidden dims to full 128-lane MXU tiles.
    d_pad = _round_up(D_in, 128)
    h_pad = _round_up(H, 128)
    h_slab = _largest_tile(h_pad)              # epilogue slab (<= 512 rows)
    budget = _vmem_budget_bytes()

    def resident_need(tb):
        return (2 * tb * d_pad * esz           # x tile (double-buffered)
                + 2 * h_pad * d_pad * esz      # resident W1 (2 bufs, worst case)
                + 2 * h_pad * 128 * 4          # (H,2) bias/w2 block, lane-padded
                + 2 * 8 * tb * 4               # (1,TB) output block, sublane-padded
                + 2 * h_slab * tb * 4          # live hT slab + headroom
                + (2 << 20))                   # misc compiler scratch

    def ktiled_need(tb, tk):
        return (2 * tb * tk * esz
                + 2 * h_pad * tk * esz
                + 2 * h_pad * 128 * 4
                + 2 * 8 * tb * 4
                + 2 * h_pad * tb * 4           # f32 accumulator + dot temp
                + (2 << 20))

    # Batch tile: multiple of 128; when B > 128, force >= 2 tiles so v7x's
    # second TensorCore gets work; shrink until the per-tile VMEM fits.
    if block_b is not None:
        tb = _round_up(max(int(block_b), 1), 128)
    elif B <= 128:
        tb = 128
    else:
        tb = min(1024, _round_up(pl.cdiv(B, 2), 128))

    use_ktiled = force_k_tiled or resident_need(128) > budget
    tk = _largest_tile(d_pad) if use_ktiled else d_pad
    need_fn = (lambda t: ktiled_need(t, tk)) if use_ktiled else resident_need
    if block_b is None:
        while tb > 128 and need_fn(tb) > budget:
            tb -= 128

    b_pad = _round_up(B, tb)
    num_b = b_pad // tb

    # Wrapper-side layout plumbing (cheap, fused by XLA): zero-pad, cast,
    # pack b1 / w2 into one (H_pad, 2) f32 array.
    x_p = x
    if (b_pad, d_pad) != (B, D_in):
        x_p = jnp.pad(x, ((0, b_pad - B), (0, d_pad - D_in)))
    x_p = x_p.astype(cd)
    w1_p = w1
    if (h_pad, d_pad) != (H, D_in):
        w1_p = jnp.pad(w1, ((0, h_pad - H), (0, d_pad - D_in)))
    w1_p = w1_p.astype(cd)
    bw = jnp.zeros((h_pad, 2), jnp.float32)
    bw = bw.at[:H, 0].set(b1.astype(jnp.float32))
    bw = bw.at[:H, 1].set(w2.reshape(-1).astype(jnp.float32))
    b2c = b2.reshape(1).astype(jnp.float32)

    vmem_limit = int(budget)

    def run(single_buffer_consts):
        const = (dict(pipeline_mode=pl.Buffered(1)) if single_buffer_consts else {})
        if use_ktiled:
            grid_spec = pltpu.PrefetchScalarGridSpec(
                num_scalar_prefetch=0,
                grid=(num_b, d_pad // tk),
                in_specs=[
                    pl.BlockSpec((tb, tk), lambda i, k: (i, k)),              # x
                    pl.BlockSpec((h_pad, tk), lambda i, k: (0, k)),           # W1 (K-tiled)
                    pl.BlockSpec((h_pad, 2), lambda i, k: (0, 0), **const),   # [b1|w2]
                    pl.BlockSpec(memory_space=pltpu.MemorySpace.SMEM),        # b2
                ],
                out_specs=pl.BlockSpec((1, tb), lambda i, k: (0, i)),
                scratch_shapes=[pltpu.VMEM((h_pad, tb), jnp.float32)],
            )
            kernel = _ktiled_kernel
            dims = ("parallel", "arbitrary")
        else:
            grid_spec = pltpu.PrefetchScalarGridSpec(
                num_scalar_prefetch=0,
                grid=(num_b,),
                in_specs=[
                    pl.BlockSpec((tb, d_pad), lambda i: (i, 0)),              # x
                    pl.BlockSpec((h_pad, d_pad), lambda i: (0, 0), **const),  # W1 resident
                    pl.BlockSpec((h_pad, 2), lambda i: (0, 0), **const),      # [b1|w2]
                    pl.BlockSpec(memory_space=pltpu.MemorySpace.SMEM),        # b2
                ],
                out_specs=pl.BlockSpec((1, tb), lambda i: (0, i)),
            )
            kernel = _make_resident_kernel(h_slab)
            dims = ("parallel",)
        return pl.pallas_call(
            kernel,
            out_shape=jax.ShapeDtypeStruct((1, b_pad), jnp.float32),
            grid_spec=grid_spec,
            compiler_params=pltpu.CompilerParams(
                dimension_semantics=dims,
                vmem_limit_bytes=vmem_limit),
        )(x_p, w1_p, bw, b2c)

    try:
        out_t = run(True)        # single-buffer the constant weight blocks
    except Exception:            # pl.Buffered(1) unsupported -> default buffering
        out_t = run(False)

    # Lane-dense (1, B_pad) slab -> (B, 1), dropping padded batch columns.
    return out_t[0, :B].reshape(B, 1)


def init_params(key, input_size, hidden_size):
    """nn.Linear-style U(-1/sqrt(fan_in), 1/sqrt(fan_in)) init, PyTorch layouts."""
    k1, k2, k3, k4 = jax.random.split(key, 4)
    bound1 = 1.0 / (input_size ** 0.5)
    bound2 = 1.0 / (hidden_size ** 0.5)
    w1 = jax.random.uniform(k1, (hidden_size, input_size), jnp.float32, -bound1, bound1)
    b1 = jax.random.uniform(k2, (hidden_size,), jnp.float32, -bound1, bound1)
    w2 = jax.random.uniform(k3, (1, hidden_size), jnp.float32, -bound2, bound2)
    b2 = jax.random.uniform(k4, (1,), jnp.float32, -bound2, bound2)
    return w1, b1, w2, b2


def reference_forward(x, w1, b1, w2, b2):
    """Pure-JAX reference (HIGHEST precision so it is a true f32 oracle)."""
    hi = jax.lax.Precision.HIGHEST
    h = jnp.maximum(jnp.dot(x, w1.T, precision=hi) + b1, 0.0)
    return jax.nn.sigmoid(jnp.dot(h, w2.T, precision=hi) + b2)


if __name__ == "__main__":
    key = jax.random.PRNGKey(0)
    kx1, kx2, kp = jax.random.split(key, 3)

    # --- Case 1: module-sized shapes, default bf16 fc1, single batch tile. ---
    input_size, hidden_size, batch = 16, 32, 8
    w1, b1, w2, b2 = init_params(kp, input_size, hidden_size)
    x = jax.random.normal(kx1, (batch, input_size), jnp.float32)

    out = jax.block_until_ready(classifier_forward(x, w1, b1, w2, b2))
    assert out.shape == (batch, 1), out.shape
    # Tight check vs a reference with the same bf16 operand quantization.
    x_q = x.astype(jnp.bfloat16).astype(jnp.float32)
    w1_q = w1.astype(jnp.bfloat16).astype(jnp.float32)
    ref_q = reference_forward(x_q, w1_q, b1, w2, b2)
    assert jnp.allclose(out, ref_q, atol=2e-5, rtol=2e-5), (out, ref_q)
    # Loose check vs the exact-f32 reference (bf16 fc1 operands).
    ref = reference_forward(x, w1, b1, w2, b2)
    assert jnp.allclose(out, ref, atol=1e-2, rtol=1e-2), (out, ref)

    # --- Case 2: batch > tile (padding + multi-tile grid), resident weights. ---
    batch2 = 300
    x2 = jax.random.normal(kx2, (batch2, input_size), jnp.float32)
    out2 = jax.block_until_ready(classifier_forward(x2, w1, b1, w2, b2, block_b=128))
    assert out2.shape == (batch2, 1), out2.shape
    ref2_q = reference_forward(x2.astype(jnp.bfloat16).astype(jnp.float32),
                               w1_q, b1, w2, b2)
    assert jnp.allclose(out2, ref2_q, atol=2e-5, rtol=2e-5)

    # --- Case 3: forced D_in-tiled fallback path (D_in > 128 -> 3 K tiles). ---
    in3, h3, batch3 = 300, 64, 192
    w1c, b1c, w2c, b2c = init_params(jax.random.PRNGKey(1), in3, h3)
    x3 = jax.random.normal(jax.random.PRNGKey(2), (batch3, in3), jnp.float32)
    out3 = jax.block_until_ready(
        classifier_forward(x3, w1c, b1c, w2c, b2c, block_b=128, force_k_tiled=True))
    assert out3.shape == (batch3, 1), out3.shape
    ref3_q = reference_forward(x3.astype(jnp.bfloat16).astype(jnp.float32),
                               w1c.astype(jnp.bfloat16).astype(jnp.float32),
                               b1c, w2c, b2c)
    assert jnp.allclose(out3, ref3_q, atol=2e-5, rtol=2e-5)

    print("KERNEL_OK")
</pallas_src>

<mosaic_0001>
module attributes {stable_mosaic.version = 11 : i64} {
  func.func @kernel(%arg0: i32, %arg1: memref<128x128xbf16, #tpu.memory_space<vmem>>, %arg2: memref<128x128xbf16, #tpu.memory_space<vmem>>, %arg3: memref<128x2xf32, #tpu.memory_space<vmem>>, %arg4: memref<1xf32, #tpu.memory_space<smem>>, %arg5: memref<1x128xf32, #tpu.memory_space<vmem>>) attributes {dimension_semantics = [#tpu.dimension_semantics<parallel>], iteration_bounds = array<i64: 1>, scalar_prefetch = 0 : i64, scratch_operands = 0 : i64, tpu.core_type = #tpu.core_type<tc>, window_params = [{transform_indices = @transform_0, window_bounds = array<i64: 128, 128>}, {pipeline_mode = #tpu.pipeline_mode<synchronous>, transform_indices = @transform_1, window_bounds = array<i64: 128, 128>}, {pipeline_mode = #tpu.pipeline_mode<synchronous>, transform_indices = @transform_2, window_bounds = array<i64: 128, 2>}, {transform_indices = @transform_3, window_bounds = array<i64: 1>}, {transform_indices = @transform_4, window_bounds = array<i64: 1, 128>}]} {
    %c0 = arith.constant 0 : index
    %c0_0 = arith.constant 0 : index
    %0 = vector.load %arg1[%c0, %c0_0] : memref<128x128xbf16, #tpu.memory_space<vmem>>, vector<128x128xbf16>
    %cst = arith.constant 0.000000e+00 : f32
    %1 = vector.broadcast %cst : f32 to vector<1x128xf32>
    %c0_i32 = arith.constant 0 : i32
    %c128_i32 = arith.constant 128 : i32
    %2 = arith.muli %c0_i32, %c128_i32 : i32
    %3 = tpu.assume_multiple %2, 128 : i32
    %4 = arith.index_cast %3 : i32 to index
    %c0_1 = arith.constant 0 : index
    %5 = vector.load %arg2[%4, %c0_1] : memref<128x128xbf16, #tpu.memory_space<vmem>>, vector<128x128xbf16>
    %6 = arith.index_cast %3 : i32 to index
    %c0_2 = arith.constant 0 : index
    %7 = vector.load %arg3[%6, %c0_2] : memref<128x2xf32, #tpu.memory_space<vmem>>, vector<128x2xf32>
    %cst_3 = arith.constant dense<0.000000e+00> : vector<128x128xf32>
    %8 = tpu.matmul %5, %0, %cst_3 {dimension_numbers = #tpu.dot_dimension_numbers<[1], [1], [0], [0], [0, 0, 1, 0], [], []>} : vector<128x128xbf16>, vector<128x128xbf16>, vector<128x128xf32> -> vector<128x128xf32>
    %9 = vector.extract_strided_slice %7 {offsets = [0, 0], sizes = [128, 1], strides = [1, 1]} : vector<128x2xf32> to vector<128x1xf32>
    %10 = vector.broadcast %9 : vector<128x1xf32> to vector<128x128xf32>
    %11 = arith.addf %8, %10 : vector<128x128xf32>
    %cst_4 = arith.constant 0.000000e+00 : f32
    %12 = vector.broadcast %cst_4 : f32 to vector<128x128xf32>
    %13 = arith.maximumf %11, %12 : vector<128x128xf32>
    %14 = vector.extract_strided_slice %7 {offsets = [0, 1], sizes = [128, 1], strides = [1, 1]} : vector<128x2xf32> to vector<128x1xf32>
    %15 = vector.broadcast %14 : vector<128x1xf32> to vector<128x128xf32>
    %16 = arith.mulf %13, %15 : vector<128x128xf32>
    %cst_5 = arith.constant dense<0.000000e+00> : vector<128xf32>
    %17 = vector.multi_reduction <add>, %16, %cst_5 [0] : vector<128x128xf32> to vector<128xf32>
    %18 = vector.shape_cast %17 : vector<128xf32> to vector<1x128xf32>
    %19 = arith.addf %1, %18 : vector<1x128xf32>
    %c1_i32 = arith.constant 1 : i32
    %c0_6 = arith.constant 0 : index
    %20 = memref.load %arg4[%c0_6] : memref<1xf32, #tpu.memory_space<smem>>
    %21 = vector.broadcast %20 : f32 to vector<1x128xf32>
    %22 = arith.addf %19, %21 : vector<1x128xf32>
    %23 = arith.negf %22 : vector<1x128xf32>
    %24 = math.exp %23 : vector<1x128xf32>
    %cst_7 = arith.constant 1.000000e+00 : f32
    %25 = vector.broadcast %cst_7 : f32 to vector<1x128xf32>
    %26 = arith.addf %25, %24 : vector<1x128xf32>
    %27 = arith.divf %25, %26 : vector<1x128xf32>
    %c0_8 = arith.constant 0 : index
    %c0_9 = arith.constant 0 : index
    %28 = vector.load %arg5[%c0_8, %c0_9] : memref<1x128xf32, #tpu.memory_space<vmem>>, vector<1x128xf32>
    tpu.vector_store %arg5[%c0_8, %c0_9], %27 {strides = array<i32>} : memref<1x128xf32, #tpu.memory_space<vmem>>, vector<1x128xf32>,
    return
  }
  func.func @transform_0(%arg0: i32) -> (i32, i32) {
    %c0_i32 = arith.constant 0 : i32
    %c0_i32_0 = arith.constant 0 : i32
    return %arg0, %c0_i32 : i32, i32
  }
  func.func @transform_1(%arg0: i32) -> (i32, i32) {
    %c0_i32 = arith.constant 0 : i32
    %c0_i32_0 = arith.constant 0 : i32
    %c0_i32_1 = arith.constant 0 : i32
    return %c0_i32, %c0_i32_0 : i32, i32
  }
  func.func @transform_2(%arg0: i32) -> (i32, i32) {
    %c0_i32 = arith.constant 0 : i32
    %c0_i32_0 = arith.constant 0 : i32
    %c0_i32_1 = arith.constant 0 : i32
    return %c0_i32, %c0_i32_0 : i32, i32
  }
  func.func @transform_3(%arg0: i32) -> i32 {
    %c0_i32 = arith.constant 0 : i32
    %c0_i32_0 = arith.constant 0 : i32
    return %c0_i32 : i32
  }
  func.func @transform_4(%arg0: i32) -> (i32, i32) {
    %c0_i32 = arith.constant 0 : i32
    %c0_i32_0 = arith.constant 0 : i32
    return %c0_i32, %arg0 : i32, i32
  }
}

module attributes {stable_mosaic.version = 11 : i64} {
  func.func @kernel(%arg0: i32, %arg1: memref<128x128xbf16, #tpu.memory_space<vmem>>, %arg2: memref<128x128xbf16, #tpu.memory_space<vmem>>, %arg3: memref<128x2xf32, #tpu.memory_space<vmem>>, %arg4: memref<1xf32, #tpu.memory_space<smem>>, %arg5: memref<1x128xf32, #tpu.memory_space<vmem>>) attributes {dimension_semantics = [#tpu.dimension_semantics<parallel>], iteration_bounds = array<i64: 1>, scalar_prefetch = 0 : i64, scratch_operands = 0 : i64, tpu.core_type = #tpu.core_type<tc>, window_params = [{transform_indices = @transform_0, window_bounds = array<i64: 128, 128>}, {pipeline_mode = #tpu.pipeline_mode<synchronous>, transform_indices = @transform_1, window_bounds = array<i64: 128, 128>}, {pipeline_mode = #tpu.pipeline_mode<synchronous>, transform_indices = @transform_2, window_bounds = array<i64: 128, 2>}, {transform_indices = @transform_3, window_bounds = array<i64: 1>}, {transform_indices = @transform_4, window_bounds = array<i64: 1, 128>}]} {
    %c0 = arith.constant 0 : index
    %c0_0 = arith.constant 0 : index
    %0 = vector.load %arg1[%c0, %c0_0] : memref<128x128xbf16, #tpu.memory_space<vmem>>, vector<128x128xbf16>
    %cst = arith.constant 0.000000e+00 : f32
    %1 = vector.broadcast %cst : f32 to vector<1x128xf32>
    %c0_i32 = arith.constant 0 : i32
    %c128_i32 = arith.constant 128 : i32
    %2 = arith.muli %c0_i32, %c128_i32 : i32
    %3 = tpu.assume_multiple %2, 128 : i32
    %4 = arith.index_cast %3 : i32 to index
    %c0_1 = arith.constant 0 : index
    %5 = vector.load %arg2[%4, %c0_1] : memref<128x128xbf16, #tpu.memory_space<vmem>>, vector<128x128xbf16>
    %6 = arith.index_cast %3 : i32 to index
    %c0_2 = arith.constant 0 : index
    %7 = vector.load %arg3[%6, %c0_2] : memref<128x2xf32, #tpu.memory_space<vmem>>, vector<128x2xf32>
    %cst_3 = arith.constant dense<0.000000e+00> : vector<128x128xf32>
    %8 = tpu.matmul %5, %0, %cst_3 {dimension_numbers = #tpu.dot_dimension_numbers<[1], [1], [0], [0], [0, 0, 1, 0], [], []>} : vector<128x128xbf16>, vector<128x128xbf16>, vector<128x128xf32> -> vector<128x128xf32>
    %9 = vector.extract_strided_slice %7 {offsets = [0, 0], sizes = [128, 1], strides = [1, 1]} : vector<128x2xf32> to vector<128x1xf32>
    %10 = vector.broadcast %9 : vector<128x1xf32> to vector<128x128xf32>
    %11 = arith.addf %8, %10 : vector<128x128xf32>
    %cst_4 = arith.constant 0.000000e+00 : f32
    %12 = vector.broadcast %cst_4 : f32 to vector<128x128xf32>
    %13 = arith.maximumf %11, %12 : vector<128x128xf32>
    %14 = vector.extract_strided_slice %7 {offsets = [0, 1], sizes = [128, 1], strides = [1, 1]} : vector<128x2xf32> to vector<128x1xf32>
    %15 = vector.broadcast %14 : vector<128x1xf32> to vector<128x128xf32>
    %16 = arith.mulf %13, %15 : vector<128x128xf32>
    %cst_5 = arith.constant dense<0.000000e+00> : vector<128xf32>
    %17 = vector.multi_reduction <add>, %16, %cst_5 [0] : vector<128x128xf32> to vector<128xf32>
    %18 = vector.shape_cast %17 : vector<128xf32> to vector<1x128xf32>
    %19 = arith.addf %1, %18 : vector<1x128xf32>
    %c1_i32 = arith.constant 1 : i32
    %c0_6 = arith.constant 0 : index
    %20 = memref.load %arg4[%c0_6] : memref<1xf32, #tpu.memory_space<smem>>
    %21 = vector.broadcast %20 : f32 to vector<1x128xf32>
    %22 = arith.addf %19, %21 : vector<1x128xf32>
    %23 = arith.negf %22 : vector<1x128xf32>
    %24 = math.exp %23 : vector<1x128xf32>
    %cst_7 = arith.constant 1.000000e+00 : f32
    %25 = vector.broadcast %cst_7 : f32 to vector<1x128xf32>
    %26 = arith.addf %25, %24 : vector<1x128xf32>
    %27 = arith.divf %25, %26 : vector<1x128xf32>
    %c0_8 = arith.constant 0 : index
    %c0_9 = arith.constant 0 : index
    %28 = vector.load %arg5[%c0_8, %c0_9] : memref<1x128xf32, #tpu.memory_space<vmem>>, vector<1x128xf32>
    tpu.vector_store %arg5[%c0_8, %c0_9], %27 {strides = array<i32>} : memref<1x128xf32, #tpu.memory_space<vmem>>, vector<1x128xf32>,
    return
  }
  func.func @transform_0(%arg0: i32) -> (i32, i32) {
    %c0_i32 = arith.constant 0 : i32
    %c0_i32_0 = arith.constant 0 : i32
    return %arg0, %c0_i32 : i32, i32
  }
  func.func @transform_1(%arg0: i32) -> (i32, i32) {
    %c0_i32 = arith.constant 0 : i32
    %c0_i32_0 = arith.constant 0 : i32
    %c0_i32_1 = arith.constant 0 : i32
    return %c0_i32, %c0_i32_0 : i32, i32
  }
  func.func @transform_2(%arg0: i32) -> (i32, i32) {
    %c0_i32 = arith.constant 0 : i32
    %c0_i32_0 = arith.constant 0 : i32
    %c0_i32_1 = arith.constant 0 : i32
    return %c0_i32, %c0_i32_0 : i32, i32
  }
  func.func @transform_3(%arg0: i32) -> i32 {
    %c0_i32 = arith.constant 0 : i32
    %c0_i32_0 = arith.constant 0 : i32
    return %c0_i32 : i32
  }
  func.func @transform_4(%arg0: i32) -> (i32, i32) {
    %c0_i32 = arith.constant 0 : i32
    %c0_i32_0 = arith.constant 0 : i32
    return %c0_i32, %arg0 : i32, i32
  }
}

</mosaic_0001>

<bundles_post_ra>
// kernel: tpu_custom_call.1
= control target key start
LH: loop header
LB: loop body
LE: loop exit
PB: predicated region body
PF: predicated region fallthrough
CT: control target
= control target key end

     0   :  { %v598_v1 = vmov 0   ;;  %v599_v3 = vmov 1   ;;  %s751_s0 = inlined_call_operand.vmem [shape: bf16[128,128], index: 0, kind: input, shape index: {}]   ;;  %s752_s1 = inlined_call_operand.vmem [shape: bf16[128,128], index: 1, kind: input, shape index: {}]   ;;  %s753_s2 = inlined_call_operand.vmem [shape: f32[128,2], index: 2, kind: input, shape index: {}]   ;;  %s754_s3 = inlined_call_operand.<no memory space> [shape: f32[1], index: 3, kind: input, shape index: {}]   ;;  %s755_s4 = inlined_call_operand.hbm [shape: f32[1,128], index: 4, kind: output, shape index: {}]  }
   0x1   :  { %v521_v0 = vld [vmem:[%s751_s0 + $0x38] sm:$0xff]  ;;  %557 = vset.pattern.permute.xlu1 %v598_v1  ;;  %v53_v2 = vld [vmem:[%s753_s2 + $0x10] sm:$0xff]  ;;  %561 = vset.pattern.permute.xlu0 %v599_v3  ;;  %v55_v4 = vld [vmem:[%s753_s2 + $0x20] sm:$0xff] }
   0x2   :  { %243 = vmatpush.bf16.xpose.msra.mxu0 %v521_v0  ;;  %530 = vmatpush.bf16.xpose.msra.mxu1 %v521_v0 }
   0x3   :  { %531 = vmatpush.bf16.xpose.msra.mxu2 %v521_v0  ;;  %532 = vmatpush.bf16.xpose.msra.mxu3 %v521_v0 }
   0x4   :  { %79 = vperm.xlu1 %557, %v53_v2   ;;  %317 = vperm.xlu0 %561, %v53_v2  }
   0x5   :  { %10 = vsyncpa [#allocation4], 0  ;;  %558 = vset.pattern.permute.xlu2 %v598_v1  ;;  %v520_v5 = vld [vmem:[%s751_s0 + $0x30] sm:$0xff]  ;;  %v54_v6 = vld [vmem:[%s753_s2 + $0x18] sm:$0xff]  ;;  %s600_s26 = smov [#allocation3]  }
   0x6   :  { %89 = vperm.xlu2 %558, %v55_v4   ;;  %v58_v7 = vld [vmem:[%s753_s2 + $0x38] sm:$0xff]  ;;  %v56_v8 = vld [vmem:[%s753_s2 + $0x28] sm:$0xff]  ;;  %v61_v10 = vld [vmem:[%s753_s2 + $0x50] sm:$0xff]  ;;  %s438_s27 = sshll.u32 %s600_s26, 4  ;;  %s439_s27 = int_to_ptr.vmem [resolvable:$true] %s438_s27 }
   0x7   :  { %v519_v9 = vld [vmem:[%s751_s0 + $0x28] sm:$0xff]  ;;  %v59_v11 = vld [vmem:[%s753_s2 + $0x40] sm:$0xff]  ;;  %v62_v14 = vld [vmem:[%s753_s2 + $0x58] sm:$0xff] }
   0x8   :  { %v518_v12 = vld [vmem:[%s751_s0 + $0x20] sm:$0xff]  ;;  %v517_v15 = vld [vmem:[%s751_s0 + $0x18] sm:$0xff]  ;;  %v52_v16 = vld [vmem:[%s753_s2 + $0x8] sm:$0xff] }
   0x9   :  { %v51_v13 = vld [vmem:[%s753_s2] sm:$0xff]  ;;  %v516_v17 = vld [vmem:[%s751_s0 + $0x10] sm:$0xff]  ;;  %v515_v19 = vld [vmem:[%s751_s0 + $0x8] sm:$0xff] }
   0xa   :  { %244 = vmatpush.bf16.xpose.msra.mxu0 %v520_v5  ;;  %533 = vmatpush.bf16.xpose.msra.mxu1 %v520_v5  ;;  %v57_v18 = vld [vmem:[%s753_s2 + $0x30] sm:$0xff]  ;;  %v60_v20 = vld [vmem:[%s753_s2 + $0x48] sm:$0xff]  ;;  %v514_v21 = vld [vmem:[%s751_s0] sm:$0xff] }
   0xb   :  { %534 = vmatpush.bf16.xpose.msra.mxu2 %v520_v5  ;;  %535 = vmatpush.bf16.xpose.msra.mxu3 %v520_v5  ;;  %v63_v22 = vld [vmem:[%s753_s2 + $0x60] sm:$0xff]  ;;  %v524_v24 = vld [vmem:[%s752_s1 + $0x10] sm:$0xff]  ;;  %v64_v28 = vld [vmem:[%s753_s2 + $0x68] sm:$0xff] }
   0xc   :  { %84 = vperm.xlu1 %557, %v54_v6   ;;  %337 = vperm.xlu0 %561, %v58_v7   ;;  %v522_v23 = vld [vmem:[%s752_s1] sm:$0xff]  ;;  %v528_v26 = vld [vmem:[%s752_s1 + $0x30] sm:$0xff]  ;;  %v523_v29 = vld [vmem:[%s752_s1 + $0x8] sm:$0xff] }
   0xd   :  { %v526_v25 = vld [vmem:[%s752_s1 + $0x20] sm:$0xff]  ;;  %v65_v27 = vld [vmem:[%s753_s2 + $0x70] sm:$0xff]  ;;  %v525_v30 = vld [vmem:[%s752_s1 + $0x18] sm:$0xff] }
   0xe   :  { %94 = vperm.xlu2 %558, %v56_v8   ;;  %v66_v31 = vld [vmem:[%s753_s2 + $0x78] sm:$0xff]  ;;  %v527_v32 = vld [vmem:[%s752_s1 + $0x28] sm:$0xff] }
   0xf   :  { %v529_v33 = vld [vmem:[%s752_s1 + $0x38] sm:$0xff] }
  0x12   :  { %245 = vmatpush.bf16.xpose.msra.mxu0 %v519_v9  ;;  %536 = vmatpush.bf16.xpose.msra.mxu1 %v519_v9 }
  0x13   :  { %537 = vmatpush.bf16.xpose.msra.mxu2 %v519_v9  ;;  %538 = vmatpush.bf16.xpose.msra.mxu3 %v519_v9 }
  0x14   :  { %104 = vperm.xlu1 %557, %v58_v7   ;;  %349 = vperm.xlu0 %561, %v61_v10  }
  0x16   :  { %109 = vperm.xlu2 %558, %v59_v11  }
  0x1a   :  { %246 = vmatpush.bf16.xpose.msra.mxu0 %v518_v12  ;;  %539 = vmatpush.bf16.xpose.msra.mxu1 %v518_v12 }
  0x1b   :  { %540 = vmatpush.bf16.xpose.msra.mxu2 %v518_v12  ;;  %541 = vmatpush.bf16.xpose.msra.mxu3 %v518_v12 }
  0x1c   :  { %119 = vperm.xlu1 %557, %v61_v10   ;;  %562 = vset.pattern.permute.xlu0 %v598_v1 }
  0x1d   :  { %69 = vperm.xlu0 %562, %v51_v13  }
  0x1e   :  { %124 = vperm.xlu2 %558, %v62_v14  }
  0x22   :  { %247 = vmatpush.bf16.xpose.msra.mxu0 %v517_v15  ;;  %542 = vmatpush.bf16.xpose.msra.mxu1 %v517_v15 }
  0x23   :  { %543 = vmatpush.bf16.xpose.msra.mxu2 %v517_v15  ;;  %544 = vmatpush.bf16.xpose.msra.mxu3 %v517_v15 }
  0x24   :  { %559 = vset.pattern.permute.xlu1 %v599_v3 }
  0x25   :  { %309 = vperm.xlu1 %559, %v51_v13   ;;  %74 = vperm.xlu0 %562, %v52_v16  }
  0x26   :  { %560 = vset.pattern.permute.xlu2 %v599_v3 }
  0x27   :  { %313 = vperm.xlu2 %560, %v52_v16  }
  0x2a   :  { %248 = vmatpush.bf16.xpose.msra.mxu0 %v516_v17  ;;  %545 = vmatpush.bf16.xpose.msra.mxu1 %v516_v17 }
  0x2b   :  { %546 = vmatpush.bf16.xpose.msra.mxu2 %v516_v17  ;;  %547 = vmatpush.bf16.xpose.msra.mxu3 %v516_v17 }
  0x2d   :  { %321 = vperm.xlu1 %559, %v54_v6   ;;  %99 = vperm.xlu0 %562, %v57_v18  }
  0x2f   :  { %325 = vperm.xlu2 %560, %v55_v4  }
  0x32   :  { %249 = vmatpush.bf16.xpose.msra.mxu0 %v515_v19  ;;  %548 = vmatpush.bf16.xpose.msra.mxu1 %v515_v19 }
  0x33   :  { %549 = vmatpush.bf16.xpose.msra.mxu2 %v515_v19  ;;  %550 = vmatpush.bf16.xpose.msra.mxu3 %v515_v19 }
  0x35   :  { %329 = vperm.xlu1 %559, %v56_v8   ;;  %114 = vperm.xlu0 %562, %v60_v20  }
  0x37   :  { %333 = vperm.xlu2 %560, %v57_v18  }
  0x3a   :  { %250 = vmatpush.bf16.xpose.msra.mxu0 %v514_v21  ;;  %551 = vmatpush.bf16.xpose.msra.mxu1 %v514_v21 }
  0x3b   :  { %552 = vmatpush.bf16.xpose.msra.mxu2 %v514_v21  ;;  %553 = vmatpush.bf16.xpose.msra.mxu3 %v514_v21 }
  0x3d   :  { %341 = vperm.xlu1 %559, %v59_v11   ;;  %129 = vperm.xlu0 %562, %v63_v22  }
  0x3f   :  { %345 = vperm.xlu2 %560, %v60_v20  }
  0x41   :  { %251 = vmatmul.bf16.vlgmr.msra.gmra.mxu0 %v522_v23  ;;  %261 = vmatmul.bf16.vlgmr.msra.gmra.mxu1 %v524_v24 }
  0x42   :  { %271 = vmatmul.bf16.vlgmr.msra.gmra.mxu2 %v526_v25  ;;  %281 = vmatmul.bf16.vlgmr.msra.gmra.mxu3 %v528_v26 }
  0x45   :  { %563 = vset.pattern.permute.xlu1 %v598_v1  ;;  %139 = vperm.xlu0 %562, %v65_v27  }
  0x46   :  { %134 = vperm.xlu1 %563, %v64_v28  }
  0x47   :  { %353 = vperm.xlu2 %560, %v62_v14  }
  0x4d   :  { %567 = vset.pattern.permute.xlu0 %v599_v3 }
  0x4e   :  { %564 = vset.pattern.permute.xlu1 %v599_v3  ;;  %369 = vperm.xlu0 %567, %v66_v31  }
  0x4f   :  { %357 = vperm.xlu1 %564, %v63_v22   ;;  %565 = vset.pattern.permute.xlu2 %v598_v1 }
  0x50   :  { %144 = vperm.xlu2 %565, %v66_v31  }
  0x51   :  { %256 = vmatmul.bf16.gmra.mxu0 %v523_v29  ;;  %266 = vmatmul.bf16.gmra.mxu1 %v525_v30 }
  0x52   :  { %276 = vmatmul.bf16.gmra.mxu2 %v527_v32  ;;  %286 = vmatmul.bf16.gmra.mxu3 %v529_v33 }
  0x57   :  { %361 = vperm.xlu1 %564, %v64_v28  }
  0x58   :  { %566 = vset.pattern.permute.xlu2 %v599_v3 }
  0x59   :  { %365 = vperm.xlu2 %566, %v65_v27  }
  0x60   :  { %v90_v35 = vpop.permute.xlu2 %89 }
  0x68   :  { %v95_v37 = vpop.permute.xlu2 %94 }
  0x70   :  { %v110_v40 = vpop.permute.xlu2 %109 }
  0x76   :  { %v80_v34 = vpop.permute.xlu1 %79  ;;  %v318_v38 = vpop.permute.xlu0 %317 }
  0x78   :  { %v737_v43 = vpop.permute.xlu2 %124 }
  0x7e   :  { %v85_v36 = vpop.permute.xlu1 %84  ;;  %v733_v41 = vpop.permute.xlu0 %337 }
  0x81   :  { %v314_v46 = vpop.permute.xlu2 %313 }
  0x86   :  { %v105_v39 = vpop.permute.xlu1 %104  ;;  %v739_v44 = vpop.permute.xlu0 %349 }
  0x89   :  { %v326_v49 = vpop.permute.xlu2 %325 }
  0x8e   :  { %v735_v42 = vpop.permute.xlu1 %119 }
  0x8f   :  { %v70_v47 = vpop.permute.xlu0 %69 }
  0x91   :  { %v334_v57 = vpop.permute.xlu2 %333 }
  0x97   :  { %v310_v45 = vpop.permute.xlu1 %309  ;;  %v75_v52 = vpop.permute.xlu0 %74 }
  0x99   :  { %v346_v4 = vpop.permute.xlu2 %345 }
  0x9f   :  { %v322_v48 = vpop.permute.xlu1 %321  ;;  %v100_v58 = vpop.permute.xlu0 %99 }
  0xa1   :  { %v354_v27 = vpop.permute.xlu2 %353 }
  0xa7   :  { %v330_v53 = vpop.permute.xlu1 %329  ;;  %v115_v7 = vpop.permute.xlu0 %114 }
  0xaf   :  { %v342_v2 = vpop.permute.xlu1 %341  ;;  %v130_v32 = vpop.permute.xlu0 %129 }
  0xb8   :  { %v135_v22 = vpop.permute.xlu1 %134 }
  0xbe   :  { %v252_v50 = vpop.f32.mrf.mxu0  ;;  %v262_v51 = vpop.f32.mrf.mxu1 }
  0xbf   :  { %v253_v0 = vadd.f32 %v252_v50, %v70_v47  ;;  %v263_v8 = vadd.f32 %v262_v51, %v90_v35 }
  0xc1   :  { %v292_v5 = vmax.f32 %v253_v0, 0.0  ;;  %v296_v18 = vmax.f32 %v263_v8, 0.0 }
  0xc3   :  { %v372_v13 = vmul.f32 %v310_v45, %v292_v5  ;;  %v376_v28 = vmul.f32 %v326_v49, %v296_v18  ;;  %v358_v49 = vpop.permute.xlu1 %357 }
  0xc5   :  { %v272_v54 = vpop.f32.mrf.mxu2  ;;  %v282_v59 = vpop.f32.mrf.mxu3 }
  0xc6   :  { %v254_v55 = vpop.f32.mrf.mxu0  ;;  %v264_v56 = vpop.f32.mrf.mxu1  ;;  %v273_v29 = vadd.f32 %v272_v54, %v110_v40 }
  0xc7   :  { %v255_v60 = vadd.f32 %v254_v55, %v75_v52  ;;  %v265_v14 = vadd.f32 %v264_v56, %v95_v37  ;;  %v145_v52 = vpop.permute.xlu2 %144 }
  0xc8   :  { %v300_v45 = vmax.f32 %v273_v29, 0.0 }
  0xc9   :  { %v293_v3 = vmax.f32 %v255_v60, 0.0  ;;  %v297_v23 = vmax.f32 %v265_v14, 0.0 }
  0xca   :  { %v380_v54 = vmul.f32 %v342_v2, %v300_v45 }
  0xcb   :  { %v373_v9 = vmul.f32 %v314_v46, %v293_v3  ;;  %v377_v33 = vmul.f32 %v330_v53, %v297_v23  ;;  %v283_v53 = vadd.f32 %v282_v59, %v130_v32 }
  0xcd   :  { %v274_v61 = vpop.f32.mrf.mxu2  ;;  %v284_v10 = vpop.f32.mrf.mxu3  ;;  %v388_v19 = vadd.f32 %v373_v9, %v372_v13 }
  0xce   :  { %v257_v62 = vpop.f32.mrf.mxu0  ;;  %v267_v63 = vpop.f32.mrf.mxu1  ;;  %v285_v60 = vadd.f32 %v284_v10, %v135_v22  ;;  %v411_v22 = vstv %s754_s3  ;;  %s440_s3 = sshll.u32 %s755_s4, 4  ;;  %s441_s3 = int_to_ptr.hbm [resolvable:$true] %s440_s3 }
  0xcf   :  { %v258_v1 = vadd.f32 %v257_v62, %v80_v34  ;;  %v268_v20 = vadd.f32 %v267_v63, %v100_v58  ;;  %v275_v34 = vadd.f32 %v274_v61, %v115_v7  ;;  %v362_v7 = vpop.permute.xlu1 %361  ;;  %v366_v9 = vpop.permute.xlu2 %365 }
  0xd0   :  { %v305_v3 = vmax.f32 %v285_v60, 0.0 }
  0xd1   :  { %v294_v6 = vmax.f32 %v258_v1, 0.0  ;;  %v298_v30 = vmax.f32 %v268_v20, 0.0  ;;  %v301_v51 = vmax.f32 %v275_v34, 0.0 }
  0xd3   :  { %v374_v15 = vmul.f32 %v318_v38, %v294_v6  ;;  %v378_v46 = vmul.f32 %v334_v57, %v298_v30  ;;  %v381_v58 = vmul.f32 %v346_v4, %v301_v51  ;;  %v140_v57 = vpop.permute.xlu0 %139  ;;  %v385_v4 = vmul.f32 %v362_v7, %v305_v3 }
  0xd5   :  { %v277_v11 = vpop.f32.mrf.mxu2  ;;  %v389_v24 = vadd.f32 %v388_v19, %v374_v15  ;;  %v287_v37 = vpop.f32.mrf.mxu3 }
  0xd6   :  { %v259_v12 = vpop.f32.mrf.mxu0  ;;  %v269_v17 = vpop.f32.mrf.mxu1  ;;  %v278_v47 = vadd.f32 %v277_v11, %v735_v42  ;;  %v304_v42 = vmax.f32 %v283_v53, 0.0  ;;  %v288_v1 = vadd.f32 %v287_v37, %v140_v57 }
  0xd7   :  { %v260_v16 = vadd.f32 %v259_v12, %v85_v36  ;;  %v270_v26 = vadd.f32 %v269_v17, %v105_v39 }
  0xd8   :  { %v302_v55 = vmax.f32 %v278_v47, 0.0  ;;  %v384_v2 = vmul.f32 %v358_v49, %v304_v42  ;;  %v306_v59 = vmax.f32 %v288_v1, 0.0 }
  0xd9   :  { %v295_v21 = vmax.f32 %v260_v16, 0.0  ;;  %v299_v36 = vmax.f32 %v270_v26, 0.0 }
  0xda   :  { %v382_v0 = vmul.f32 %v739_v44, %v302_v55  ;;  %v386_v13 = vmul.f32 %v366_v9, %v306_v59 }
  0xdb   :  { %v375_v25 = vmul.f32 %v322_v48, %v295_v21  ;;  %v379_v39 = vmul.f32 %v733_v41, %v299_v36  ;;  %v370_v12 = vpop.permute.xlu0 %369 }
  0xdd   :  { %v390_v31 = vadd.f32 %v389_v24, %v375_v25  ;;  %v279_v38 = vpop.f32.mrf.mxu2  ;;  %v289_v63 = vpop.f32.mrf.mxu3 }
  0xde   :  { %v280_v40 = vadd.f32 %v279_v38, %v737_v43  ;;  %v290_v6 = vadd.f32 %v289_v63, %v145_v52 }
  0xdf   :  { %v391_v35 = vadd.f32 %v390_v31, %v376_v28 }
  0xe0   :  { %v303_v62 = vmax.f32 %v280_v40, 0.0  ;;  %v307_v11 = vmax.f32 %v290_v6, 0.0 }
  0xe1   :  { %v392_v50 = vadd.f32 %v391_v35, %v377_v33 }
  0xe2   :  { %v383_v5 = vmul.f32 %v354_v27, %v303_v62  ;;  %v387_v15 = vmul.f32 %v370_v12, %v307_v11 }
  0xe3   :  { %v393_v48 = vadd.f32 %v392_v50, %v378_v46 }
  0xe5   :  { %v394_v56 = vadd.f32 %v393_v48, %v379_v39 }
  0xe7   :  { %v395_v61 = vadd.f32 %v394_v56, %v380_v54 }
  0xe9   :  { %v396_v41 = vadd.f32 %v395_v61, %v381_v58 }
  0xeb   :  { %v397_v43 = vadd.f32 %v396_v41, %v382_v0 }
  0xed   :  { %v398_v8 = vadd.f32 %v397_v43, %v383_v5 }
  0xef   :  { %v399_v10 = vadd.f32 %v398_v8, %v384_v2 }
  0xf1   :  { %v400_v14 = vadd.f32 %v399_v10, %v385_v4 }
  0xf3   :  { %v401_v16 = vadd.f32 %v400_v14, %v386_v13 }
  0xf5   :  { %v402_v44 = vadd.f32 %v401_v16, %v387_v15 }
  0xf7   :  { %v403_v17 = vrot.slane %v402_v44, 4 }
  0xf9   :  { %v404_v18 = vadd.f32 %v403_v17, %v402_v44 }
  0xfb   :  { %v405_v19 = vrot.slane %v404_v18, 2 }
  0xfd   :  { %v406_v20 = vadd.f32 %v405_v19, %v404_v18 }
  0xff   :  { %v407_v21 = vrot.slane %v406_v20, 1 }
 0x101   :  { %v408_v23 = vadd.f32 %v407_v21, %v406_v20 }
 0x103   :  { %v412_v24 = vadd.f32 %v411_v22, %v408_v23 }
 0x105   :  { %v513_v25 = vmul.f32 -1.442695, %v412_v24 }
 0x107   :  { %568 = vpow2.f32 %v513_v25 }
 0x10d   :  { %v569_v26 = vpop.eup %568 }
 0x10e   :  { %v416_v27 = vadd.f32 1.0, %v569_v26 }
 0x110   :  { %570 = vrcp.f32 %v416_v27  ;;  %v428_v31 = vand.u32 2147483648, %v416_v27  ;;  %v426_v33 = vand.u32 2147483647, %v416_v27  ;;  %vm422_vm1 = vweird.f32 %v416_v27 }
 0x112   :  { %v429_v35 = vor.u32 1.1754944e-38, %v428_v31  ;;  %vm427_vm3 = vcmp.eq.f32.partialorder %v426_v33, 8.507059e+37 }
 0x116   :  { %v571_v28 = vpop.eup %570 }
 0x117   :  { %v418_v29 = vmul.f32 %v571_v28, %v416_v27  ;;  %vm423_vm0 = vweird.f32 %v571_v28 }
 0x118   :  { %vm424_vm2 = vmor %vm422_vm1, %vm423_vm0 }
 0x119   :  { %v419_v30 = vsub.f32 1.0, %v418_v29 }
 0x11b   :  { %v420_v32 = vmul.f32 %v571_v28, %v419_v30 }
 0x11d   :  { %v421_v34 = vadd.f32 %v571_v28, %v420_v32 }
 0x11f   :  { %v425_v36 = vsel %vm424_vm2, %v571_v28, %v421_v34 }
 0x120   :  { %v430_v37 = vsel %vm427_vm3, %v429_v35, %v425_v36 }
 0x121   :  { %432 = vst [vmem:[#allocation3] sm:$0x1] %v430_v37 }
 0x122   :  { %443 = dma.vmem_to_hbm [thread:$0]  %s439_s27, 16, %s441_s3, [#allocation4]  }
 0x123   :  { %596 = dma.done.wait [#allocation4], 16  }
 0x124   :  { %597 = vsyncadd [#allocation4], 4294967280 }
 0x125   :  { %448 = vsyncpa [#allocation4], 1 }

// kernel: tpu_custom_call.1
= control target key start
LH: loop header
LB: loop body
LE: loop exit
PB: predicated region body
PF: predicated region fallthrough
CT: control target
= control target key end

     0   :  { %v598_v1 = vmov 0   ;;  %v599_v3 = vmov 1   ;;  %s751_s0 = inlined_call_operand.vmem [shape: bf16[128,128], index: 0, kind: input, shape index: {}]   ;;  %s752_s1 = inlined_call_operand.vmem [shape: bf16[128,128], index: 1, kind: input, shape index: {}]   ;;  %s753_s2 = inlined_call_operand.vmem [shape: f32[128,2], index: 2, kind: input, shape index: {}]   ;;  %s754_s3 = inlined_call_operand.<no memory space> [shape: f32[1], index: 3, kind: input, shape index: {}]   ;;  %s755_s4 = inlined_call_operand.hbm [shape: f32[1,128], index: 4, kind: output, shape index: {}]  }
   0x1   :  { %v521_v0 = vld [vmem:[%s751_s0 + $0x38] sm:$0xff]  ;;  %557 = vset.pattern.permute.xlu1 %v598_v1  ;;  %v53_v2 = vld [vmem:[%s753_s2 + $0x10] sm:$0xff]  ;;  %561 = vset.pattern.permute.xlu0 %v599_v3  ;;  %v55_v4 = vld [vmem:[%s753_s2 + $0x20] sm:$0xff] }
   0x2   :  { %243 = vmatpush.bf16.xpose.msra.mxu0 %v521_v0  ;;  %530 = vmatpush.bf16.xpose.msra.mxu1 %v521_v0 }
   0x3   :  { %531 = vmatpush.bf16.xpose.msra.mxu2 %v521_v0  ;;  %532 = vmatpush.bf16.xpose.msra.mxu3 %v521_v0 }
   0x4   :  { %79 = vperm.xlu1 %557, %v53_v2   ;;  %317 = vperm.xlu0 %561, %v53_v2  }
   0x5   :  { %10 = vsyncpa [#allocation4], 0  ;;  %558 = vset.pattern.permute.xlu2 %v598_v1  ;;  %v520_v5 = vld [vmem:[%s751_s0 + $0x30] sm:$0xff]  ;;  %v54_v6 = vld [vmem:[%s753_s2 + $0x18] sm:$0xff]  ;;  %s600_s26 = smov [#allocation3]  }
   0x6   :  { %89 = vperm.xlu2 %558, %v55_v4   ;;  %v58_v7 = vld [vmem:[%s753_s2 + $0x38] sm:$0xff]  ;;  %v56_v8 = vld [vmem:[%s753_s2 + $0x28] sm:$0xff]  ;;  %v61_v10 = vld [vmem:[%s753_s2 + $0x50] sm:$0xff]  ;;  %s438_s27 = sshll.u32 %s600_s26, 4  ;;  %s439_s27 = int_to_ptr.vmem [resolvable:$true] %s438_s27 }
   0x7   :  { %v519_v9 = vld [vmem:[%s751_s0 + $0x28] sm:$0xff]  ;;  %v59_v11 = vld [vmem:[%s753_s2 + $0x40] sm:$0xff]  ;;  %v62_v14 = vld [vmem:[%s753_s2 + $0x58] sm:$0xff] }
   0x8   :  { %v518_v12 = vld [vmem:[%s751_s0 + $0x20] sm:$0xff]  ;;  %v517_v15 = vld [vmem:[%s751_s0 + $0x18] sm:$0xff]  ;;  %v52_v16 = vld [vmem:[%s753_s2 + $0x8] sm:$0xff] }
   0x9   :  { %v51_v13 = vld [vmem:[%s753_s2] sm:$0xff]  ;;  %v516_v17 = vld [vmem:[%s751_s0 + $0x10] sm:$0xff]  ;;  %v515_v19 = vld [vmem:[%s751_s0 + $0x8] sm:$0xff] }
   0xa   :  { %244 = vmatpush.bf16.xpose.msra.mxu0 %v520_v5  ;;  %533 = vmatpush.bf16.xpose.msra.mxu1 %v520_v5  ;;  %v57_v18 = vld [vmem:[%s753_s2 + $0x30] sm:$0xff]  ;;  %v60_v20 = vld [vmem:[%s753_s2 + $0x48] sm:$0xff]  ;;  %v514_v21 = vld [vmem:[%s751_s0] sm:$0xff] }
   0xb   :  { %534 = vmatpush.bf16.xpose.msra.mxu2 %v520_v5  ;;  %535 = vmatpush.bf16.xpose.msra.mxu3 %v520_v5  ;;  %v63_v22 = vld [vmem:[%s753_s2 + $0x60] sm:$0xff]  ;;  %v524_v24 = vld [vmem:[%s752_s1 + $0x10] sm:$0xff]  ;;  %v64_v28 = vld [vmem:[%s753_s2 + $0x68] sm:$0xff] }
   0xc   :  { %84 = vperm.xlu1 %557, %v54_v6   ;;  %337 = vperm.xlu0 %561, %v58_v7   ;;  %v522_v23 = vld [vmem:[%s752_s1] sm:$0xff]  ;;  %v528_v26 = vld [vmem:[%s752_s1 + $0x30] sm:$0xff]  ;;  %v523_v29 = vld [vmem:[%s752_s1 + $0x8] sm:$0xff] }
   0xd   :  { %v526_v25 = vld [vmem:[%s752_s1 + $0x20] sm:$0xff]  ;;  %v65_v27 = vld [vmem:[%s753_s2 + $0x70] sm:$0xff]  ;;  %v525_v30 = vld [vmem:[%s752_s1 + $0x18] sm:$0xff] }
   0xe   :  { %94 = vperm.xlu2 %558, %v56_v8   ;;  %v66_v31 = vld [vmem:[%s753_s2 + $0x78] sm:$0xff]  ;;  %v527_v32 = vld [vmem:[%s752_s1 + $0x28] sm:$0xff] }
   0xf   :  { %v529_v33 = vld [vmem:[%s752_s1 + $0x38] sm:$0xff] }
  0x12   :  { %245 = vmatpush.bf16.xpose.msra.mxu0 %v519_v9  ;;  %536 = vmatpush.bf16.xpose.msra.mxu1 %v519_v9 }
  0x13   :  { %537 = vmatpush.bf16.xpose.msra.mxu2 %v519_v9  ;;  %538 = vmatpush.bf16.xpose.msra.mxu3 %v519_v9 }
  0x14   :  { %104 = vperm.xlu1 %557, %v58_v7   ;;  %349 = vperm.xlu0 %561, %v61_v10  }
  0x16   :  { %109 = vperm.xlu2 %558, %v59_v11  }
  0x1a   :  { %246 = vmatpush.bf16.xpose.msra.mxu0 %v518_v12  ;;  %539 = vmatpush.bf16.xpose.msra.mxu1 %v518_v12 }
  0x1b   :  { %540 = vmatpush.bf16.xpose.msra.mxu2 %v518_v12  ;;  %541 = vmatpush.bf16.xpose.msra.mxu3 %v518_v12 }
  0x1c   :  { %119 = vperm.xlu1 %557, %v61_v10   ;;  %562 = vset.pattern.permute.xlu0 %v598_v1 }
  0x1d   :  { %69 = vperm.xlu0 %562, %v51_v13  }
  0x1e   :  { %124 = vperm.xlu2 %558, %v62_v14  }
  0x22   :  { %247 = vmatpush.bf16.xpose.msra.mxu0 %v517_v15  ;;  %542 = vmatpush.bf16.xpose.msra.mxu1 %v517_v15 }
  0x23   :  { %543 = vmatpush.bf16.xpose.msra.mxu2 %v517_v15  ;;  %544 = vmatpush.bf16.xpose.msra.mxu3 %v517_v15 }
  0x24   :  { %559 = vset.pattern.permute.xlu1 %v599_v3 }
  0x25   :  { %309 = vperm.xlu1 %559, %v51_v13   ;;  %74 = vperm.xlu0 %562, %v52_v16  }
  0x26   :  { %560 = vset.pattern.permute.xlu2 %v599_v3 }
  0x27   :  { %313 = vperm.xlu2 %560, %v52_v16  }
  0x2a   :  { %248 = vmatpush.bf16.xpose.msra.mxu0 %v516_v17  ;;  %545 = vmatpush.bf16.xpose.msra.mxu1 %v516_v17 }
  0x2b   :  { %546 = vmatpush.bf16.xpose.msra.mxu2 %v516_v17  ;;  %547 = vmatpush.bf16.xpose.msra.mxu3 %v516_v17 }
  0x2d   :  { %321 = vperm.xlu1 %559, %v54_v6   ;;  %99 = vperm.xlu0 %562, %v57_v18  }
  0x2f   :  { %325 = vperm.xlu2 %560, %v55_v4  }
  0x32   :  { %249 = vmatpush.bf16.xpose.msra.mxu0 %v515_v19  ;;  %548 = vmatpush.bf16.xpose.msra.mxu1 %v515_v19 }
  0x33   :  { %549 = vmatpush.bf16.xpose.msra.mxu2 %v515_v19  ;;  %550 = vmatpush.bf16.xpose.msra.mxu3 %v515_v19 }
  0x35   :  { %329 = vperm.xlu1 %559, %v56_v8   ;;  %114 = vperm.xlu0 %562, %v60_v20  }
  0x37   :  { %333 = vperm.xlu2 %560, %v57_v18  }
  0x3a   :  { %250 = vmatpush.bf16.xpose.msra.mxu0 %v514_v21  ;;  %551 = vmatpush.bf16.xpose.msra.mxu1 %v514_v21 }
  0x3b   :  { %552 = vmatpush.bf16.xpose.msra.mxu2 %v514_v21  ;;  %553 = vmatpush.bf16.xpose.msra.mxu3 %v514_v21 }
  0x3d   :  { %341 = vperm.xlu1 %559, %v59_v11   ;;  %129 = vperm.xlu0 %562, %v63_v22  }
  0x3f   :  { %345 = vperm.xlu2 %560, %v60_v20  }
  0x41   :  { %251 = vmatmul.bf16.vlgmr.msra.gmra.mxu0 %v522_v23  ;;  %261 = vmatmul.bf16.vlgmr.msra.gmra.mxu1 %v524_v24 }
  0x42   :  { %271 = vmatmul.bf16.vlgmr.msra.gmra.mxu2 %v526_v25  ;;  %281 = vmatmul.bf16.vlgmr.msra.gmra.mxu3 %v528_v26 }
  0x45   :  { %563 = vset.pattern.permute.xlu1 %v598_v1  ;;  %139 = vperm.xlu0 %562, %v65_v27  }
  0x46   :  { %134 = vperm.xlu1 %563, %v64_v28  }
  0x47   :  { %353 = vperm.xlu2 %560, %v62_v14  }
  0x4d   :  { %567 = vset.pattern.permute.xlu0 %v599_v3 }
  0x4e   :  { %564 = vset.pattern.permute.xlu1 %v599_v3  ;;  %369 = vperm.xlu0 %567, %v66_v31  }
  0x4f   :  { %357 = vperm.xlu1 %564, %v63_v22   ;;  %565 = vset.pattern.permute.xlu2 %v598_v1 }
  0x50   :  { %144 = vperm.xlu2 %565, %v66_v31  }
  0x51   :  { %256 = vmatmul.bf16.gmra.mxu0 %v523_v29  ;;  %266 = vmatmul.bf16.gmra.mxu1 %v525_v30 }
  0x52   :  { %276 = vmatmul.bf16.gmra.mxu2 %v527_v32  ;;  %286 = vmatmul.bf16.gmra.mxu3 %v529_v33 }
  0x57   :  { %361 = vperm.xlu1 %564, %v64_v28  }
  0x58   :  { %566 = vset.pattern.permute.xlu2 %v599_v3 }
  0x59   :  { %365 = vperm.xlu2 %566, %v65_v27  }
  0x60   :  { %v90_v35 = vpop.permute.xlu2 %89 }
  0x68   :  { %v95_v37 = vpop.permute.xlu2 %94 }
  0x70   :  { %v110_v40 = vpop.permute.xlu2 %109 }
  0x76   :  { %v80_v34 = vpop.permute.xlu1 %79  ;;  %v318_v38 = vpop.permute.xlu0 %317 }
  0x78   :  { %v737_v43 = vpop.permute.xlu2 %124 }
  0x7e   :  { %v85_v36 = vpop.permute.xlu1 %84  ;;  %v733_v41 = vpop.permute.xlu0 %337 }
  0x81   :  { %v314_v46 = vpop.permute.xlu2 %313 }
  0x86   :  { %v105_v39 = vpop.permute.xlu1 %104  ;;  %v739_v44 = vpop.permute.xlu0 %349 }
  0x89   :  { %v326_v49 = vpop.permute.xlu2 %325 }
  0x8e   :  { %v735_v42 = vpop.permute.xlu1 %119 }
  0x8f   :  { %v70_v47 = vpop.permute.xlu0 %69 }
  0x91   :  { %v334_v57 = vpop.permute.xlu2 %333 }
  0x97   :  { %v310_v45 = vpop.permute.xlu1 %309  ;;  %v75_v52 = vpop.permute.xlu0 %74 }
  0x99   :  { %v346_v4 = vpop.permute.xlu2 %345 }
  0x9f   :  { %v322_v48 = vpop.permute.xlu1 %321  ;;  %v100_v58 = vpop.permute.xlu0 %99 }
  0xa1   :  { %v354_v27 = vpop.permute.xlu2 %353 }
  0xa7   :  { %v330_v53 = vpop.permute.xlu1 %329  ;;  %v115_v7 = vpop.permute.xlu0 %114 }
  0xaf   :  { %v342_v2 = vpop.permute.xlu1 %341  ;;  %v130_v32 = vpop.permute.xlu0 %129 }
  0xb8   :  { %v135_v22 = vpop.permute.xlu1 %134 }
  0xbe   :  { %v252_v50 = vpop.f32.mrf.mxu0  ;;  %v262_v51 = vpop.f32.mrf.mxu1 }
  0xbf   :  { %v253_v0 = vadd.f32 %v252_v50, %v70_v47  ;;  %v263_v8 = vadd.f32 %v262_v51, %v90_v35 }
  0xc1   :  { %v292_v5 = vmax.f32 %v253_v0, 0.0  ;;  %v296_v18 = vmax.f32 %v263_v8, 0.0 }
  0xc3   :  { %v372_v13 = vmul.f32 %v310_v45, %v292_v5  ;;  %v376_v28 = vmul.f32 %v326_v49, %v296_v18  ;;  %v358_v49 = vpop.permute.xlu1 %357 }
  0xc5   :  { %v272_v54 = vpop.f32.mrf.mxu2  ;;  %v282_v59 = vpop.f32.mrf.mxu3 }
  0xc6   :  { %v254_v55 = vpop.f32.mrf.mxu0  ;;  %v264_v56 = vpop.f32.mrf.mxu1  ;;  %v273_v29 = vadd.f32 %v272_v54, %v110_v40 }
  0xc7   :  { %v255_v60 = vadd.f32 %v254_v55, %v75_v52  ;;  %v265_v14 = vadd.f32 %v264_v56, %v95_v37  ;;  %v145_v52 = vpop.permute.xlu2 %144 }
  0xc8   :  { %v300_v45 = vmax.f32 %v273_v29, 0.0 }
  0xc9   :  { %v293_v3 = vmax.f32 %v255_v60, 0.0  ;;  %v297_v23 = vmax.f32 %v265_v14, 0.0 }
  0xca   :  { %v380_v54 = vmul.f32 %v342_v2, %v300_v45 }
  0xcb   :  { %v373_v9 = vmul.f32 %v314_v46, %v293_v3  ;;  %v377_v33 = vmul.f32 %v330_v53, %v297_v23  ;;  %v283_v53 = vadd.f32 %v282_v59, %v130_v32 }
  0xcd   :  { %v274_v61 = vpop.f32.mrf.mxu2  ;;  %v284_v10 = vpop.f32.mrf.mxu3  ;;  %v388_v19 = vadd.f32 %v373_v9, %v372_v13 }
  0xce   :  { %v257_v62 = vpop.f32.mrf.mxu0  ;;  %v267_v63 = vpop.f32.mrf.mxu1  ;;  %v285_v60 = vadd.f32 %v284_v10, %v135_v22  ;;  %v411_v22 = vstv %s754_s3  ;;  %s440_s3 = sshll.u32 %s755_s4, 4  ;;  %s441_s3 = int_to_ptr.hbm [resolvable:$true] %s440_s3 }
  0xcf   :  { %v258_v1 = vadd.f32 %v257_v62, %v80_v34  ;;  %v268_v20 = vadd.f32 %v267_v63, %v100_v58  ;;  %v275_v34 = vadd.f32 %v274_v61, %v115_v7  ;;  %v362_v7 = vpop.permute.xlu1 %361  ;;  %v366_v9 = vpop.permute.xlu2 %365 }
  0xd0   :  { %v305_v3 = vmax.f32 %v285_v60, 0.0 }
  0xd1   :  { %v294_v6 = vmax.f32 %v258_v1, 0.0  ;;  %v298_v30 = vmax.f32 %v268_v20, 0.0  ;;  %v301_v51 = vmax.f32 %v275_v34, 0.0 }
  0xd3   :  { %v374_v15 = vmul.f32 %v318_v38, %v294_v6  ;;  %v378_v46 = vmul.f32 %v334_v57, %v298_v30  ;;  %v381_v58 = vmul.f32 %v346_v4, %v301_v51  ;;  %v140_v57 = vpop.permute.xlu0 %139  ;;  %v385_v4 = vmul.f32 %v362_v7, %v305_v3 }
  0xd5   :  { %v277_v11 = vpop.f32.mrf.mxu2  ;;  %v389_v24 = vadd.f32 %v388_v19, %v374_v15  ;;  %v287_v37 = vpop.f32.mrf.mxu3 }
  0xd6   :  { %v259_v12 = vpop.f32.mrf.mxu0  ;;  %v269_v17 = vpop.f32.mrf.mxu1  ;;  %v278_v47 = vadd.f32 %v277_v11, %v735_v42  ;;  %v304_v42 = vmax.f32 %v283_v53, 0.0  ;;  %v288_v1 = vadd.f32 %v287_v37, %v140_v57 }
  0xd7   :  { %v260_v16 = vadd.f32 %v259_v12, %v85_v36  ;;  %v270_v26 = vadd.f32 %v269_v17, %v105_v39 }
  0xd8   :  { %v302_v55 = vmax.f32 %v278_v47, 0.0  ;;  %v384_v2 = vmul.f32 %v358_v49, %v304_v42  ;;  %v306_v59 = vmax.f32 %v288_v1, 0.0 }
  0xd9   :  { %v295_v21 = vmax.f32 %v260_v16, 0.0  ;;  %v299_v36 = vmax.f32 %v270_v26, 0.0 }
  0xda   :  { %v382_v0 = vmul.f32 %v739_v44, %v302_v55  ;;  %v386_v13 = vmul.f32 %v366_v9, %v306_v59 }
  0xdb   :  { %v375_v25 = vmul.f32 %v322_v48, %v295_v21  ;;  %v379_v39 = vmul.f32 %v733_v41, %v299_v36  ;;  %v370_v12 = vpop.permute.xlu0 %369 }
  0xdd   :  { %v390_v31 = vadd.f32 %v389_v24, %v375_v25  ;;  %v279_v38 = vpop.f32.mrf.mxu2  ;;  %v289_v63 = vpop.f32.mrf.mxu3 }
  0xde   :  { %v280_v40 = vadd.f32 %v279_v38, %v737_v43  ;;  %v290_v6 = vadd.f32 %v289_v63, %v145_v52 }
  0xdf   :  { %v391_v35 = vadd.f32 %v390_v31, %v376_v28 }
  0xe0   :  { %v303_v62 = vmax.f32 %v280_v40, 0.0  ;;  %v307_v11 = vmax.f32 %v290_v6, 0.0 }
  0xe1   :  { %v392_v50 = vadd.f32 %v391_v35, %v377_v33 }
  0xe2   :  { %v383_v5 = vmul.f32 %v354_v27, %v303_v62  ;;  %v387_v15 = vmul.f32 %v370_v12, %v307_v11 }
  0xe3   :  { %v393_v48 = vadd.f32 %v392_v50, %v378_v46 }
  0xe5   :  { %v394_v56 = vadd.f32 %v393_v48, %v379_v39 }
  0xe7   :  { %v395_v61 = vadd.f32 %v394_v56, %v380_v54 }
  0xe9   :  { %v396_v41 = vadd.f32 %v395_v61, %v381_v58 }
  0xeb   :  { %v397_v43 = vadd.f32 %v396_v41, %v382_v0 }
  0xed   :  { %v398_v8 = vadd.f32 %v397_v43, %v383_v5 }
  0xef   :  { %v399_v10 = vadd.f32 %v398_v8, %v384_v2 }
  0xf1   :  { %v400_v14 = vadd.f32 %v399_v10, %v385_v4 }
  0xf3   :  { %v401_v16 = vadd.f32 %v400_v14, %v386_v13 }
  0xf5   :  { %v402_v44 = vadd.f32 %v401_v16, %v387_v15 }
  0xf7   :  { %v403_v17 = vrot.slane %v402_v44, 4 }
  0xf9   :  { %v404_v18 = vadd.f32 %v403_v17, %v402_v44 }
  0xfb   :  { %v405_v19 = vrot.slane %v404_v18, 2 }
  0xfd   :  { %v406_v20 = vadd.f32 %v405_v19, %v404_v18 }
  0xff   :  { %v407_v21 = vrot.slane %v406_v20, 1 }
 0x101   :  { %v408_v23 = vadd.f32 %v407_v21, %v406_v20 }
 0x103   :  { %v412_v24 = vadd.f32 %v411_v22, %v408_v23 }
 0x105   :  { %v513_v25 = vmul.f32 -1.442695, %v412_v24 }
 0x107   :  { %568 = vpow2.f32 %v513_v25 }
 0x10d   :  { %v569_v26 = vpop.eup %568 }
 0x10e   :  { %v416_v27 = vadd.f32 1.0, %v569_v26 }
 0x110   :  { %570 = vrcp.f32 %v416_v27  ;;  %v428_v31 = vand.u32 2147483648, %v416_v27  ;;  %v426_v33 = vand.u32 2147483647, %v416_v27  ;;  %vm422_vm1 = vweird.f32 %v416_v27 }
 0x112   :  { %v429_v35 = vor.u32 1.1754944e-38, %v428_v31  ;;  %vm427_vm3 = vcmp.eq.f32.partialorder %v426_v33, 8.507059e+37 }
 0x116   :  { %v571_v28 = vpop.eup %570 }
 0x117   :  { %v418_v29 = vmul.f32 %v571_v28, %v416_v27  ;;  %vm423_vm0 = vweird.f32 %v571_v28 }
 0x118   :  { %vm424_vm2 = vmor %vm422_vm1, %vm423_vm0 }
 0x119   :  { %v419_v30 = vsub.f32 1.0, %v418_v29 }
 0x11b   :  { %v420_v32 = vmul.f32 %v571_v28, %v419_v30 }
 0x11d   :  { %v421_v34 = vadd.f32 %v571_v28, %v420_v32 }
 0x11f   :  { %v425_v36 = vsel %vm424_vm2, %v571_v28, %v421_v34 }
 0x120   :  { %v430_v37 = vsel %vm427_vm3, %v429_v35, %v425_v36 }
 0x121   :  { %432 = vst [vmem:[#allocation3] sm:$0x1] %v430_v37 }
 0x122   :  { %443 = dma.vmem_to_hbm [thread:$0]  %s439_s27, 16, %s441_s3, [#allocation4]  }
 0x123   :  { %596 = dma.done.wait [#allocation4], 16  }
 0x124   :  { %597 = vsyncadd [#allocation4], 4294967280 }
 0x125   :  { %448 = vsyncpa [#allocation4], 1 }

</bundles_post_ra>
